<compile_context>
chip_gen: v6e
topology: v6e:2x2x1
jax: 0.10.0
libtpu: 0.0.40
codegen_flags: <defaults>
</compile_context>

<pallas_src>
import jax
import jax.numpy as jnp
from jax.experimental import pallas as pl
from jax.experimental.pallas import tpu as pltpu


def make_positional_encoding(max_len, d_model):
    """Matches PositionalEncoding._get_positional_embeddings (shape [max_len, d_model])."""
    position = jnp.arange(max_len, dtype=jnp.float32)[:, None]
    div_term = jnp.exp(
        jnp.arange(0, d_model, 2, dtype=jnp.float32) * -(jnp.log(10000.0) / d_model)
    )
    angles = position * div_term  # [max_len, d_model//2]
    pe = jnp.zeros((max_len, d_model), dtype=jnp.float32)
    pe = pe.at[:, 0::2].set(jnp.sin(angles))
    pe = pe.at[:, 1::2].set(jnp.cos(angles))
    return pe


def transformer_embed(tokens, emb_table, pe_table):
    """tokens: [seq, batch] int32, emb_table: [vocab, d_model] f32,
    pe_table: [max_len, d_model] f32
    -> [seq, batch, d_model] f32 == emb_table[tokens] + pe_table[:seq, None, :]."""
    seq, batch = tokens.shape
    vocab, d_model = emb_table.shape
    n = seq * batch

    flat_ids = tokens.reshape(-1).astype(jnp.int32)  # flat row i -> (s=i//batch, b=i%batch)
    pe = pe_table[:seq]                              # [seq, d_model]

    G = 8  # rows per dense output slab (one full sublane tile for f32)

    def kernel(ids_ref, emb_ref, pe_ref, out_ref):
        # ids_ref: SMEM [n] int32 (scalar prefetch)
        # emb_ref: VMEM [vocab, d_model]  (resident, DMA'd once)
        # pe_ref : VMEM [seq, d_model]    (resident)
        # out_ref: VMEM [n, d_model]
        for start in range(0, n, G):
            size = min(G, n - start)
            rows = []
            for r in range(size):
                i = start + r
                tok = ids_ref[i]                       # dynamic scalar from SMEM
                row = emb_ref[pl.ds(tok, 1), :]        # (1, d_model) dynamic row gather
                pos = i // batch                       # static position index
                rows.append(row + pe_ref[pl.ds(pos, 1), :])
            # Dense (<=8, d_model) slab store at a static offset.
            out_ref[pl.ds(start, size), :] = jnp.concatenate(rows, axis=0)

    out_flat = pl.pallas_call(
        kernel,
        out_shape=jax.ShapeDtypeStruct((n, d_model), emb_table.dtype),
        grid_spec=pltpu.PrefetchScalarGridSpec(
            num_scalar_prefetch=1,  # flat_ids -> SMEM
            grid=(1,),              # single step: whole table resident, all tokens gathered
            in_specs=[
                pl.BlockSpec((vocab, d_model), lambda i, ids: (0, 0)),
                pl.BlockSpec((seq, d_model), lambda i, ids: (0, 0)),
            ],
            out_specs=pl.BlockSpec((n, d_model), lambda i, ids: (0, 0)),
        ),
        compiler_params=pltpu.CompilerParams(
            # Independent work; "parallel" is neutral on v5e/v6e and lets
            # Mosaic shard if the grid ever grows (v7x dual-TC).
            dimension_semantics=("parallel",),
        ),
    )(flat_ids, emb_table, pe)

    return out_flat.reshape(seq, batch, d_model)


if __name__ == "__main__":
    # Small shapes consistent with the module: tokens [seq, batch],
    # lane-aligned d_model.
    vocab_size = 1024
    d_model = 128
    max_len = 64
    seq, batch = 8, 4

    key = jax.random.PRNGKey(0)
    k_emb, k_tok = jax.random.split(key)

    # nn.Embedding default init ~ N(0, 1); PE buffer built deterministically.
    emb_table = jax.random.normal(k_emb, (vocab_size, d_model), dtype=jnp.float32)
    pe_table = make_positional_encoding(max_len, d_model)
    tokens = jax.random.randint(k_tok, (seq, batch), 0, vocab_size, dtype=jnp.int32)

    out = transformer_embed(tokens, emb_table, pe_table)
    out = jax.block_until_ready(out)

    # Reference: TransformerModel.forward == embedding lookup + broadcast PE add.
    ref = emb_table[tokens] + pe_table[:seq][:, None, :]
    assert out.shape == (seq, batch, d_model)
    assert jnp.allclose(out, ref, atol=1e-6), "Pallas embedding+PE mismatch"

    print("KERNEL_OK")
</pallas_src>

<mosaic_0001>
module attributes {stable_mosaic.version = 11 : i64} {
  func.func @kernel(%arg0: i32, %arg1: memref<32xi32, #tpu.memory_space<smem>>, %arg2: memref<1024x128xf32, #tpu.memory_space<vmem>>, %arg3: memref<8x128xf32, #tpu.memory_space<vmem>>, %arg4: memref<32x128xf32, #tpu.memory_space<vmem>>) attributes {dimension_semantics = [#tpu.dimension_semantics<parallel>], iteration_bounds = array<i64: 1>, scalar_prefetch = 1 : i64, scratch_operands = 0 : i64, tpu.core_type = #tpu.core_type<tc>, window_params = [{pipeline_mode = #tpu.pipeline_mode<synchronous>, transform_indices = @transform_0, window_bounds = array<i64: 1024, 128>}, {pipeline_mode = #tpu.pipeline_mode<synchronous>, transform_indices = @transform_1, window_bounds = array<i64: 8, 128>}, {pipeline_mode = #tpu.pipeline_mode<synchronous>, transform_indices = @transform_2, window_bounds = array<i64: 32, 128>}]} {
    %c0 = arith.constant 0 : index
    %0 = memref.load %arg1[%c0] : memref<32xi32, #tpu.memory_space<smem>>
    %1 = arith.index_cast %0 : i32 to index
    %c0_0 = arith.constant 0 : index
    %2 = vector.load %arg2[%1, %c0_0] : memref<1024x128xf32, #tpu.memory_space<vmem>>, vector<1x128xf32>
    %c0_1 = arith.constant 0 : index
    %c0_2 = arith.constant 0 : index
    %3 = vector.load %arg3[%c0_1, %c0_2] : memref<8x128xf32, #tpu.memory_space<vmem>>, vector<1x128xf32>
    %4 = arith.addf %2, %3 : vector<1x128xf32>
    %c1 = arith.constant 1 : index
    %5 = memref.load %arg1[%c1] : memref<32xi32, #tpu.memory_space<smem>>
    %6 = arith.index_cast %5 : i32 to index
    %c0_3 = arith.constant 0 : index
    %7 = vector.load %arg2[%6, %c0_3] : memref<1024x128xf32, #tpu.memory_space<vmem>>, vector<1x128xf32>
    %c0_4 = arith.constant 0 : index
    %c0_5 = arith.constant 0 : index
    %8 = vector.load %arg3[%c0_4, %c0_5] : memref<8x128xf32, #tpu.memory_space<vmem>>, vector<1x128xf32>
    %9 = arith.addf %7, %8 : vector<1x128xf32>
    %c2 = arith.constant 2 : index
    %10 = memref.load %arg1[%c2] : memref<32xi32, #tpu.memory_space<smem>>
    %11 = arith.index_cast %10 : i32 to index
    %c0_6 = arith.constant 0 : index
    %12 = vector.load %arg2[%11, %c0_6] : memref<1024x128xf32, #tpu.memory_space<vmem>>, vector<1x128xf32>
    %c0_7 = arith.constant 0 : index
    %c0_8 = arith.constant 0 : index
    %13 = vector.load %arg3[%c0_7, %c0_8] : memref<8x128xf32, #tpu.memory_space<vmem>>, vector<1x128xf32>
    %14 = arith.addf %12, %13 : vector<1x128xf32>
    %c3 = arith.constant 3 : index
    %15 = memref.load %arg1[%c3] : memref<32xi32, #tpu.memory_space<smem>>
    %16 = arith.index_cast %15 : i32 to index
    %c0_9 = arith.constant 0 : index
    %17 = vector.load %arg2[%16, %c0_9] : memref<1024x128xf32, #tpu.memory_space<vmem>>, vector<1x128xf32>
    %c0_10 = arith.constant 0 : index
    %c0_11 = arith.constant 0 : index
    %18 = vector.load %arg3[%c0_10, %c0_11] : memref<8x128xf32, #tpu.memory_space<vmem>>, vector<1x128xf32>
    %19 = arith.addf %17, %18 : vector<1x128xf32>
    %c4 = arith.constant 4 : index
    %20 = memref.load %arg1[%c4] : memref<32xi32, #tpu.memory_space<smem>>
    %21 = arith.index_cast %20 : i32 to index
    %c0_12 = arith.constant 0 : index
    %22 = vector.load %arg2[%21, %c0_12] : memref<1024x128xf32, #tpu.memory_space<vmem>>, vector<1x128xf32>
    %c1_13 = arith.constant 1 : index
    %c0_14 = arith.constant 0 : index
    %23 = vector.load %arg3[%c1_13, %c0_14] : memref<8x128xf32, #tpu.memory_space<vmem>>, vector<1x128xf32>
    %24 = arith.addf %22, %23 : vector<1x128xf32>
    %c5 = arith.constant 5 : index
    %25 = memref.load %arg1[%c5] : memref<32xi32, #tpu.memory_space<smem>>
    %26 = arith.index_cast %25 : i32 to index
    %c0_15 = arith.constant 0 : index
    %27 = vector.load %arg2[%26, %c0_15] : memref<1024x128xf32, #tpu.memory_space<vmem>>, vector<1x128xf32>
    %c1_16 = arith.constant 1 : index
    %c0_17 = arith.constant 0 : index
    %28 = vector.load %arg3[%c1_16, %c0_17] : memref<8x128xf32, #tpu.memory_space<vmem>>, vector<1x128xf32>
    %29 = arith.addf %27, %28 : vector<1x128xf32>
    %c6 = arith.constant 6 : index
    %30 = memref.load %arg1[%c6] : memref<32xi32, #tpu.memory_space<smem>>
    %31 = arith.index_cast %30 : i32 to index
    %c0_18 = arith.constant 0 : index
    %32 = vector.load %arg2[%31, %c0_18] : memref<1024x128xf32, #tpu.memory_space<vmem>>, vector<1x128xf32>
    %c1_19 = arith.constant 1 : index
    %c0_20 = arith.constant 0 : index
    %33 = vector.load %arg3[%c1_19, %c0_20] : memref<8x128xf32, #tpu.memory_space<vmem>>, vector<1x128xf32>
    %34 = arith.addf %32, %33 : vector<1x128xf32>
    %c7 = arith.constant 7 : index
    %35 = memref.load %arg1[%c7] : memref<32xi32, #tpu.memory_space<smem>>
    %36 = arith.index_cast %35 : i32 to index
    %c0_21 = arith.constant 0 : index
    %37 = vector.load %arg2[%36, %c0_21] : memref<1024x128xf32, #tpu.memory_space<vmem>>, vector<1x128xf32>
    %c1_22 = arith.constant 1 : index
    %c0_23 = arith.constant 0 : index
    %38 = vector.load %arg3[%c1_22, %c0_23] : memref<8x128xf32, #tpu.memory_space<vmem>>, vector<1x128xf32>
    %39 = arith.addf %37, %38 : vector<1x128xf32>
    %40 = tpu.concatenate %4, %9, %14, %19, %24, %29, %34, %39 in 0 : vector<1x128xf32>, vector<1x128xf32>, vector<1x128xf32>, vector<1x128xf32>, vector<1x128xf32>, vector<1x128xf32>, vector<1x128xf32>, vector<1x128xf32> -> vector<8x128xf32>
    %c0_24 = arith.constant 0 : index
    %c0_25 = arith.constant 0 : index
    %41 = vector.load %arg4[%c0_24, %c0_25] : memref<32x128xf32, #tpu.memory_space<vmem>>, vector<8x128xf32>
    tpu.vector_store %arg4[%c0_24, %c0_25], %40 {strides = array<i32>} : memref<32x128xf32, #tpu.memory_space<vmem>>, vector<8x128xf32>,
    %c8 = arith.constant 8 : index
    %42 = memref.load %arg1[%c8] : memref<32xi32, #tpu.memory_space<smem>>
    %43 = arith.index_cast %42 : i32 to index
    %c0_26 = arith.constant 0 : index
    %44 = vector.load %arg2[%43, %c0_26] : memref<1024x128xf32, #tpu.memory_space<vmem>>, vector<1x128xf32>
    %c2_27 = arith.constant 2 : index
    %c0_28 = arith.constant 0 : index
    %45 = vector.load %arg3[%c2_27, %c0_28] : memref<8x128xf32, #tpu.memory_space<vmem>>, vector<1x128xf32>
    %46 = arith.addf %44, %45 : vector<1x128xf32>
    %c9 = arith.constant 9 : index
    %47 = memref.load %arg1[%c9] : memref<32xi32, #tpu.memory_space<smem>>
    %48 = arith.index_cast %47 : i32 to index
    %c0_29 = arith.constant 0 : index
    %49 = vector.load %arg2[%48, %c0_29] : memref<1024x128xf32, #tpu.memory_space<vmem>>, vector<1x128xf32>
    %c2_30 = arith.constant 2 : index
    %c0_31 = arith.constant 0 : index
    %50 = vector.load %arg3[%c2_30, %c0_31] : memref<8x128xf32, #tpu.memory_space<vmem>>, vector<1x128xf32>
    %51 = arith.addf %49, %50 : vector<1x128xf32>
    %c10 = arith.constant 10 : index
    %52 = memref.load %arg1[%c10] : memref<32xi32, #tpu.memory_space<smem>>
    %53 = arith.index_cast %52 : i32 to index
    %c0_32 = arith.constant 0 : index
    %54 = vector.load %arg2[%53, %c0_32] : memref<1024x128xf32, #tpu.memory_space<vmem>>, vector<1x128xf32>
    %c2_33 = arith.constant 2 : index
    %c0_34 = arith.constant 0 : index
    %55 = vector.load %arg3[%c2_33, %c0_34] : memref<8x128xf32, #tpu.memory_space<vmem>>, vector<1x128xf32>
    %56 = arith.addf %54, %55 : vector<1x128xf32>
    %c11 = arith.constant 11 : index
    %57 = memref.load %arg1[%c11] : memref<32xi32, #tpu.memory_space<smem>>
    %58 = arith.index_cast %57 : i32 to index
    %c0_35 = arith.constant 0 : index
    %59 = vector.load %arg2[%58, %c0_35] : memref<1024x128xf32, #tpu.memory_space<vmem>>, vector<1x128xf32>
    %c2_36 = arith.constant 2 : index
    %c0_37 = arith.constant 0 : index
    %60 = vector.load %arg3[%c2_36, %c0_37] : memref<8x128xf32, #tpu.memory_space<vmem>>, vector<1x128xf32>
    %61 = arith.addf %59, %60 : vector<1x128xf32>
    %c12 = arith.constant 12 : index
    %62 = memref.load %arg1[%c12] : memref<32xi32, #tpu.memory_space<smem>>
    %63 = arith.index_cast %62 : i32 to index
    %c0_38 = arith.constant 0 : index
    %64 = vector.load %arg2[%63, %c0_38] : memref<1024x128xf32, #tpu.memory_space<vmem>>, vector<1x128xf32>
    %c3_39 = arith.constant 3 : index
    %c0_40 = arith.constant 0 : index
    %65 = vector.load %arg3[%c3_39, %c0_40] : memref<8x128xf32, #tpu.memory_space<vmem>>, vector<1x128xf32>
    %66 = arith.addf %64, %65 : vector<1x128xf32>
    %c13 = arith.constant 13 : index
    %67 = memref.load %arg1[%c13] : memref<32xi32, #tpu.memory_space<smem>>
    %68 = arith.index_cast %67 : i32 to index
    %c0_41 = arith.constant 0 : index
    %69 = vector.load %arg2[%68, %c0_41] : memref<1024x128xf32, #tpu.memory_space<vmem>>, vector<1x128xf32>
    %c3_42 = arith.constant 3 : index
    %c0_43 = arith.constant 0 : index
    %70 = vector.load %arg3[%c3_42, %c0_43] : memref<8x128xf32, #tpu.memory_space<vmem>>, vector<1x128xf32>
    %71 = arith.addf %69, %70 : vector<1x128xf32>
    %c14 = arith.constant 14 : index
    %72 = memref.load %arg1[%c14] : memref<32xi32, #tpu.memory_space<smem>>
    %73 = arith.index_cast %72 : i32 to index
    %c0_44 = arith.constant 0 : index
    %74 = vector.load %arg2[%73, %c0_44] : memref<1024x128xf32, #tpu.memory_space<vmem>>, vector<1x128xf32>
    %c3_45 = arith.constant 3 : index
    %c0_46 = arith.constant 0 : index
    %75 = vector.load %arg3[%c3_45, %c0_46] : memref<8x128xf32, #tpu.memory_space<vmem>>, vector<1x128xf32>
    %76 = arith.addf %74, %75 : vector<1x128xf32>
    %c15 = arith.constant 15 : index
    %77 = memref.load %arg1[%c15] : memref<32xi32, #tpu.memory_space<smem>>
    %78 = arith.index_cast %77 : i32 to index
    %c0_47 = arith.constant 0 : index
    %79 = vector.load %arg2[%78, %c0_47] : memref<1024x128xf32, #tpu.memory_space<vmem>>, vector<1x128xf32>
    %c3_48 = arith.constant 3 : index
    %c0_49 = arith.constant 0 : index
    %80 = vector.load %arg3[%c3_48, %c0_49] : memref<8x128xf32, #tpu.memory_space<vmem>>, vector<1x128xf32>
    %81 = arith.addf %79, %80 : vector<1x128xf32>
    %82 = tpu.concatenate %46, %51, %56, %61, %66, %71, %76, %81 in 0 : vector<1x128xf32>, vector<1x128xf32>, vector<1x128xf32>, vector<1x128xf32>, vector<1x128xf32>, vector<1x128xf32>, vector<1x128xf32>, vector<1x128xf32> -> vector<8x128xf32>
    %c8_50 = arith.constant 8 : index
    %c0_51 = arith.constant 0 : index
    %83 = vector.load %arg4[%c8_50, %c0_51] : memref<32x128xf32, #tpu.memory_space<vmem>>, vector<8x128xf32>
    tpu.vector_store %arg4[%c8_50, %c0_51], %82 {strides = array<i32>} : memref<32x128xf32, #tpu.memory_space<vmem>>, vector<8x128xf32>,
    %c16 = arith.constant 16 : index
    %84 = memref.load %arg1[%c16] : memref<32xi32, #tpu.memory_space<smem>>
    %85 = arith.index_cast %84 : i32 to index
    %c0_52 = arith.constant 0 : index
    %86 = vector.load %arg2[%85, %c0_52] : memref<1024x128xf32, #tpu.memory_space<vmem>>, vector<1x128xf32>
    %c4_53 = arith.constant 4 : index
    %c0_54 = arith.constant 0 : index
    %87 = vector.load %arg3[%c4_53, %c0_54] : memref<8x128xf32, #tpu.memory_space<vmem>>, vector<1x128xf32>
    %88 = arith.addf %86, %87 : vector<1x128xf32>
    %c17 = arith.constant 17 : index
    %89 = memref.load %arg1[%c17] : memref<32xi32, #tpu.memory_space<smem>>
    %90 = arith.index_cast %89 : i32 to index
    %c0_55 = arith.constant 0 : index
    %91 = vector.load %arg2[%90, %c0_55] : memref<1024x128xf32, #tpu.memory_space<vmem>>, vector<1x128xf32>
    %c4_56 = arith.constant 4 : index
    %c0_57 = arith.constant 0 : index
    %92 = vector.load %arg3[%c4_56, %c0_57] : memref<8x128xf32, #tpu.memory_space<vmem>>, vector<1x128xf32>
    %93 = arith.addf %91, %92 : vector<1x128xf32>
    %c18 = arith.constant 18 : index
    %94 = memref.load %arg1[%c18] : memref<32xi32, #tpu.memory_space<smem>>
    %95 = arith.index_cast %94 : i32 to index
    %c0_58 = arith.constant 0 : index
    %96 = vector.load %arg2[%95, %c0_58] : memref<1024x128xf32, #tpu.memory_space<vmem>>, vector<1x128xf32>
    %c4_59 = arith.constant 4 : index
    %c0_60 = arith.constant 0 : index
    %97 = vector.load %arg3[%c4_59, %c0_60] : memref<8x128xf32, #tpu.memory_space<vmem>>, vector<1x128xf32>
    %98 = arith.addf %96, %97 : vector<1x128xf32>
    %c19 = arith.constant 19 : index
    %99 = memref.load %arg1[%c19] : memref<32xi32, #tpu.memory_space<smem>>
    %100 = arith.index_cast %99 : i32 to index
    %c0_61 = arith.constant 0 : index
    %101 = vector.load %arg2[%100, %c0_61] : memref<1024x128xf32, #tpu.memory_space<vmem>>, vector<1x128xf32>
    %c4_62 = arith.constant 4 : index
    %c0_63 = arith.constant 0 : index
    %102 = vector.load %arg3[%c4_62, %c0_63] : memref<8x128xf32, #tpu.memory_space<vmem>>, vector<1x128xf32>
    %103 = arith.addf %101, %102 : vector<1x128xf32>
    %c20 = arith.constant 20 : index
    %104 = memref.load %arg1[%c20] : memref<32xi32, #tpu.memory_space<smem>>
    %105 = arith.index_cast %104 : i32 to index
    %c0_64 = arith.constant 0 : index
    %106 = vector.load %arg2[%105, %c0_64] : memref<1024x128xf32, #tpu.memory_space<vmem>>, vector<1x128xf32>
    %c5_65 = arith.constant 5 : index
    %c0_66 = arith.constant 0 : index
    %107 = vector.load %arg3[%c5_65, %c0_66] : memref<8x128xf32, #tpu.memory_space<vmem>>, vector<1x128xf32>
    %108 = arith.addf %106, %107 : vector<1x128xf32>
    %c21 = arith.constant 21 : index
    %109 = memref.load %arg1[%c21] : memref<32xi32, #tpu.memory_space<smem>>
    %110 = arith.index_cast %109 : i32 to index
    %c0_67 = arith.constant 0 : index
    %111 = vector.load %arg2[%110, %c0_67] : memref<1024x128xf32, #tpu.memory_space<vmem>>, vector<1x128xf32>
    %c5_68 = arith.constant 5 : index
    %c0_69 = arith.constant 0 : index
    %112 = vector.load %arg3[%c5_68, %c0_69] : memref<8x128xf32, #tpu.memory_space<vmem>>, vector<1x128xf32>
    %113 = arith.addf %111, %112 : vector<1x128xf32>
    %c22 = arith.constant 22 : index
    %114 = memref.load %arg1[%c22] : memref<32xi32, #tpu.memory_space<smem>>
    %115 = arith.index_cast %114 : i32 to index
    %c0_70 = arith.constant 0 : index
    %116 = vector.load %arg2[%115, %c0_70] : memref<1024x128xf32, #tpu.memory_space<vmem>>, vector<1x128xf32>
    %c5_71 = arith.constant 5 : index
    %c0_72 = arith.constant 0 : index
    %117 = vector.load %arg3[%c5_71, %c0_72] : memref<8x128xf32, #tpu.memory_space<vmem>>, vector<1x128xf32>
    %118 = arith.addf %116, %117 : vector<1x128xf32>
    %c23 = arith.constant 23 : index
    %119 = memref.load %arg1[%c23] : memref<32xi32, #tpu.memory_space<smem>>
    %120 = arith.index_cast %119 : i32 to index
    %c0_73 = arith.constant 0 : index
    %121 = vector.load %arg2[%120, %c0_73] : memref<1024x128xf32, #tpu.memory_space<vmem>>, vector<1x128xf32>
    %c5_74 = arith.constant 5 : index
    %c0_75 = arith.constant 0 : index
    %122 = vector.load %arg3[%c5_74, %c0_75] : memref<8x128xf32, #tpu.memory_space<vmem>>, vector<1x128xf32>
    %123 = arith.addf %121, %122 : vector<1x128xf32>
    %124 = tpu.concatenate %88, %93, %98, %103, %108, %113, %118, %123 in 0 : vector<1x128xf32>, vector<1x128xf32>, vector<1x128xf32>, vector<1x128xf32>, vector<1x128xf32>, vector<1x128xf32>, vector<1x128xf32>, vector<1x128xf32> -> vector<8x128xf32>
    %c16_76 = arith.constant 16 : index
    %c0_77 = arith.constant 0 : index
    %125 = vector.load %arg4[%c16_76, %c0_77] : memref<32x128xf32, #tpu.memory_space<vmem>>, vector<8x128xf32>
    tpu.vector_store %arg4[%c16_76, %c0_77], %124 {strides = array<i32>} : memref<32x128xf32, #tpu.memory_space<vmem>>, vector<8x128xf32>,
    %c24 = arith.constant 24 : index
    %126 = memref.load %arg1[%c24] : memref<32xi32, #tpu.memory_space<smem>>
    %127 = arith.index_cast %126 : i32 to index
    %c0_78 = arith.constant 0 : index
    %128 = vector.load %arg2[%127, %c0_78] : memref<1024x128xf32, #tpu.memory_space<vmem>>, vector<1x128xf32>
    %c6_79 = arith.constant 6 : index
    %c0_80 = arith.constant 0 : index
    %129 = vector.load %arg3[%c6_79, %c0_80] : memref<8x128xf32, #tpu.memory_space<vmem>>, vector<1x128xf32>
    %130 = arith.addf %128, %129 : vector<1x128xf32>
    %c25 = arith.constant 25 : index
    %131 = memref.load %arg1[%c25] : memref<32xi32, #tpu.memory_space<smem>>
    %132 = arith.index_cast %131 : i32 to index
    %c0_81 = arith.constant 0 : index
    %133 = vector.load %arg2[%132, %c0_81] : memref<1024x128xf32, #tpu.memory_space<vmem>>, vector<1x128xf32>
    %c6_82 = arith.constant 6 : index
    %c0_83 = arith.constant 0 : index
    %134 = vector.load %arg3[%c6_82, %c0_83] : memref<8x128xf32, #tpu.memory_space<vmem>>, vector<1x128xf32>
    %135 = arith.addf %133, %134 : vector<1x128xf32>
    %c26 = arith.constant 26 : index
    %136 = memref.load %arg1[%c26] : memref<32xi32, #tpu.memory_space<smem>>
    %137 = arith.index_cast %136 : i32 to index
    %c0_84 = arith.constant 0 : index
    %138 = vector.load %arg2[%137, %c0_84] : memref<1024x128xf32, #tpu.memory_space<vmem>>, vector<1x128xf32>
    %c6_85 = arith.constant 6 : index
    %c0_86 = arith.constant 0 : index
    %139 = vector.load %arg3[%c6_85, %c0_86] : memref<8x128xf32, #tpu.memory_space<vmem>>, vector<1x128xf32>
    %140 = arith.addf %138, %139 : vector<1x128xf32>
    %c27 = arith.constant 27 : index
    %141 = memref.load %arg1[%c27] : memref<32xi32, #tpu.memory_space<smem>>
    %142 = arith.index_cast %141 : i32 to index
    %c0_87 = arith.constant 0 : index
    %143 = vector.load %arg2[%142, %c0_87] : memref<1024x128xf32, #tpu.memory_space<vmem>>, vector<1x128xf32>
    %c6_88 = arith.constant 6 : index
    %c0_89 = arith.constant 0 : index
    %144 = vector.load %arg3[%c6_88, %c0_89] : memref<8x128xf32, #tpu.memory_space<vmem>>, vector<1x128xf32>
    %145 = arith.addf %143, %144 : vector<1x128xf32>
    %c28 = arith.constant 28 : index
    %146 = memref.load %arg1[%c28] : memref<32xi32, #tpu.memory_space<smem>>
    %147 = arith.index_cast %146 : i32 to index
    %c0_90 = arith.constant 0 : index
    %148 = vector.load %arg2[%147, %c0_90] : memref<1024x128xf32, #tpu.memory_space<vmem>>, vector<1x128xf32>
    %c7_91 = arith.constant 7 : index
    %c0_92 = arith.constant 0 : index
    %149 = vector.load %arg3[%c7_91, %c0_92] : memref<8x128xf32, #tpu.memory_space<vmem>>, vector<1x128xf32>
    %150 = arith.addf %148, %149 : vector<1x128xf32>
    %c29 = arith.constant 29 : index
    %151 = memref.load %arg1[%c29] : memref<32xi32, #tpu.memory_space<smem>>
    %152 = arith.index_cast %151 : i32 to index
    %c0_93 = arith.constant 0 : index
    %153 = vector.load %arg2[%152, %c0_93] : memref<1024x128xf32, #tpu.memory_space<vmem>>, vector<1x128xf32>
    %c7_94 = arith.constant 7 : index
    %c0_95 = arith.constant 0 : index
    %154 = vector.load %arg3[%c7_94, %c0_95] : memref<8x128xf32, #tpu.memory_space<vmem>>, vector<1x128xf32>
    %155 = arith.addf %153, %154 : vector<1x128xf32>
    %c30 = arith.constant 30 : index
    %156 = memref.load %arg1[%c30] : memref<32xi32, #tpu.memory_space<smem>>
    %157 = arith.index_cast %156 : i32 to index
    %c0_96 = arith.constant 0 : index
    %158 = vector.load %arg2[%157, %c0_96] : memref<1024x128xf32, #tpu.memory_space<vmem>>, vector<1x128xf32>
    %c7_97 = arith.constant 7 : index
    %c0_98 = arith.constant 0 : index
    %159 = vector.load %arg3[%c7_97, %c0_98] : memref<8x128xf32, #tpu.memory_space<vmem>>, vector<1x128xf32>
    %160 = arith.addf %158, %159 : vector<1x128xf32>
    %c31 = arith.constant 31 : index
    %161 = memref.load %arg1[%c31] : memref<32xi32, #tpu.memory_space<smem>>
    %162 = arith.index_cast %161 : i32 to index
    %c0_99 = arith.constant 0 : index
    %163 = vector.load %arg2[%162, %c0_99] : memref<1024x128xf32, #tpu.memory_space<vmem>>, vector<1x128xf32>
    %c7_100 = arith.constant 7 : index
    %c0_101 = arith.constant 0 : index
    %164 = vector.load %arg3[%c7_100, %c0_101] : memref<8x128xf32, #tpu.memory_space<vmem>>, vector<1x128xf32>
    %165 = arith.addf %163, %164 : vector<1x128xf32>
    %166 = tpu.concatenate %130, %135, %140, %145, %150, %155, %160, %165 in 0 : vector<1x128xf32>, vector<1x128xf32>, vector<1x128xf32>, vector<1x128xf32>, vector<1x128xf32>, vector<1x128xf32>, vector<1x128xf32>, vector<1x128xf32> -> vector<8x128xf32>
    %c24_102 = arith.constant 24 : index
    %c0_103 = arith.constant 0 : index
    %167 = vector.load %arg4[%c24_102, %c0_103] : memref<32x128xf32, #tpu.memory_space<vmem>>, vector<8x128xf32>
    tpu.vector_store %arg4[%c24_102, %c0_103], %166 {strides = array<i32>} : memref<32x128xf32, #tpu.memory_space<vmem>>, vector<8x128xf32>,
    return
  }
  func.func @transform_0(%arg0: i32, %arg1: memref<32xi32, #tpu.memory_space<smem>>) -> (i32, i32) {
    %c0_i32 = arith.constant 0 : i32
    %c0_i32_0 = arith.constant 0 : i32
    %c0_i32_1 = arith.constant 0 : i32
    return %c0_i32, %c0_i32_0 : i32, i32
  }
  func.func @transform_1(%arg0: i32, %arg1: memref<32xi32, #tpu.memory_space<smem>>) -> (i32, i32) {
    %c0_i32 = arith.constant 0 : i32
    %c0_i32_0 = arith.constant 0 : i32
    %c0_i32_1 = arith.constant 0 : i32
    return %c0_i32, %c0_i32_0 : i32, i32
  }
  func.func @transform_2(%arg0: i32, %arg1: memref<32xi32, #tpu.memory_space<smem>>) -> (i32, i32) {
    %c0_i32 = arith.constant 0 : i32
    %c0_i32_0 = arith.constant 0 : i32
    %c0_i32_1 = arith.constant 0 : i32
    return %c0_i32, %c0_i32_0 : i32, i32
  }
}

</mosaic_0001>

<bundles_post_ra>
// kernel: tpu_custom_call.1
= control target key start
LH: loop header
LB: loop body
LE: loop exit
PB: predicated region body
PF: predicated region fallthrough
CT: control target
= control target key end

     0   :  { %s465_s12 = smov [#allocation3]   ;;  %s615_s0 = inlined_call_operand.hbm [shape: s32[32], index: 0, kind: input, shape index: {}]   ;;  %s616_s1 = inlined_call_operand.hbm [shape: f32[1024,128], index: 1, kind: input, shape index: {}]   ;;  %s617_s2 = inlined_call_operand.hbm [shape: f32[8,128], index: 2, kind: input, shape index: {}]   ;;  %s618_s3 = inlined_call_operand.hbm [shape: f32[32,128], index: 3, kind: output, shape index: {}]  }
   0x1   :  { %9 = dma.hbm_to_smem %s615_s0, 16, %s465_s12, [#allocation2] }
   0x2   :  { %457 = dma.done.wait [#allocation2], 16 }
   0x3   :  { %458 = vsyncadd [#allocation2], 4294967280 }
   0x4   :  { %11 = sfence }
   0x5   :  { %12 = vsyncpa [#allocation5], 0 }
   0x6   :  { %13 = vsyncpa [#allocation8], 0 }
   0x7   :  { %14 = vsyncpa [#allocation6], 0  ;;  %s466_s15 = smov [#allocation4]  }
   0x8   :  { %s20_s16 = sshll.u32 %s466_s15, 4  ;;  %s21_s16 = int_to_ptr.vmem [resolvable:$true] %s20_s16 }
   0x9   :  { %s405_s17 = scalar_lea.vmem %s21_s16, 16384  ;;  %p410_p1 = scmp.lt.s32.totalorder %s21_s16, %s21_s16 }
   0xa   :  { %p406_p0 = scmp.ne.s32.totalorder %s21_s16, %s405_s17  ;;  %p411_p2 = scmp.lt.s32.totalorder %s405_s17, %s405_s17 }
   0xc   :  { %p412_p3 = por %p411_p2, %p410_p1 }
   0xe   :  { %p413_p4 = pnand %p412_p3, %p406_p0 }
  0x10   :  { %416 = shalt.err (!%p413_p4)
}
  0x11   :  { %s467_s18 = smov 128   ;;  %s468_s19 = smov 8  }
  0x12   :  { %26 = dma.hbm_to_vmem [thread:$0]  %s616_s1, 16384, %s21_s16, [#allocation5], %s467_s18, %s467_s18, %s468_s19  }
  0x13   :  { %s469_s21 = smov [#allocation7]  }
  0x14   :  { %s33_s22 = sshll.u32 %s469_s21, 4  ;;  %s34_s22 = int_to_ptr.vmem [resolvable:$true] %s33_s22 }
  0x15   :  { %s425_s23 = scalar_lea.vmem %s34_s22, 128  ;;  %p430_p6 = scmp.lt.s32.totalorder %s34_s22, %s34_s22 }
  0x16   :  { %p426_p5 = scmp.ne.s32.totalorder %s34_s22, %s425_s23  ;;  %p431_p7 = scmp.lt.s32.totalorder %s425_s23, %s425_s23 }
  0x18   :  { %p432_p8 = por %p431_p7, %p430_p6 }
  0x1a   :  { %p433_p9 = pnand %p432_p8, %p426_p5 }
  0x1c   :  { %436 = shalt.err (!%p433_p9)
}
  0x1d   :  { %36 = dma.hbm_to_vmem [thread:$0]  %s617_s2, 128, %s34_s22, [#allocation8]  }
  0x1e   :  { %459 = dma.done.wait [#allocation5], 16384  }
  0x1f   :  { %460 = vsyncadd [#allocation5], 4294950912 }
  0x20   :  { %461 = dma.done.wait [#allocation8], 128  }
  0x21   :  { %462 = vsyncadd [#allocation8], 4294967168  ;;  %s43_s26 = sld [smem:[#allocation3]]  ;;  %v46_v0 = vld [vmem:[#allocation7] sm:$0x1]  ;;  %vm98_vm0 = vcmask 1040384  }
  0x22   :  { %s352_s1 = sld [smem:[#allocation3 + $0x1]]  ;;  %v63_v2 = vld [vmem:[#allocation7 + $0x1] sm:$0x1]  ;;  %vm100_vm1 = vcmask 1041408   ;;  %vm102_vm2 = vcmask 1042432   ;;  %vm104_vm3 = vcmask 1043456  }
  0x23   :  { %s353_s27 = sld [smem:[#allocation3 + $0x2]]  ;;  %vm106_vm4 = vcmask 1044480   ;;  %vm108_vm5 = vcmask 1045504   ;;  %vm110_vm6 = vcmask 1046528   ;;  %v116_v28 = vld [vmem:[#allocation7 + $0x2] sm:$0x1] }
  0x24   :  { %s354_s28 = sld [smem:[#allocation3 + $0x3]]  ;;  %v133_v31 = vld [vmem:[#allocation7 + $0x3] sm:$0x1]  ;;  %v179_v47 = vld [vmem:[#allocation7 + $0x4] sm:$0x1] }
  0x25   :  { %s355_s29 = sld [smem:[#allocation3 + $0x4]] }
  0x26   :  { %s503_s30 = sld [smem:[#allocation3 + $0x5]] }
  0x27   :  { %s44_s4 = scalar_lea.vmem [#allocation4], %s43_s26  ;;  %s505_s5 = sld [smem:[#allocation3 + $0x6]] }
  0x28   :  { %v45_v1 = vld [vmem:[%s44_s4] sm:$0x1]  ;;  %s49_s6 = scalar_lea.vmem [#allocation4], %s352_s1  ;;  %s507_s2 = sld [smem:[#allocation3 + $0x7]] }
  0x29   :  { %v50_v3 = vld [vmem:[%s49_s6] sm:$0x1]  ;;  %v47_v4 = vadd.f32 %v46_v0, %v45_v1  ;;  %s53_s7 = scalar_lea.vmem [#allocation4], %s353_s27  ;;  %s509_s8 = sld [smem:[#allocation3 + $0x8]] }
  0x2a   :  { %v51_v5 = vadd.f32 %v50_v3, %v46_v0  ;;  %v54_v6 = vld [vmem:[%s53_s7] sm:$0x1]  ;;  %s57_s9 = scalar_lea.vmem [#allocation4], %s354_s28  ;;  %s511_s11 = sld [smem:[#allocation3 + $0x9]] }
  0x2b   :  { %v55_v7 = vadd.f32 %v54_v6, %v46_v0  ;;  %v58_v8 = vld [vmem:[%s57_s9] sm:$0x1]  ;;  %s61_s10 = scalar_lea.vmem [#allocation4], %s355_s29  ;;  %s514_s13 = sld [smem:[#allocation3 + $0xa]] }
  0x2c   :  { %v59_v9 = vadd.f32 %v58_v8, %v46_v0  ;;  %v62_v10 = vld [vmem:[%s61_s10] sm:$0x1]  ;;  %v78_v11 = vrot.slane %v51_v5, 7  ;;  %s66_s12 = scalar_lea.vmem [#allocation4], %s503_s30  ;;  %s517_s14 = sld [smem:[#allocation3 + $0xb]] }
  0x2d   :  { %v64_v12 = vadd.f32 %v63_v2, %v62_v10  ;;  %v67_v13 = vld [vmem:[%s66_s12] sm:$0x1]  ;;  %v81_v14 = vrot.slane %v55_v7, 6  ;;  %s70_s15 = scalar_lea.vmem [#allocation4], %s505_s5  ;;  %s521_s16 = sld [smem:[#allocation3 + $0xc]] }
  0x2e   :  { %v68_v15 = vadd.f32 %v67_v13, %v63_v2  ;;  %v84_v16 = vrot.slane %v59_v9, 5  ;;  %v99_v17 = vsel %vm98_vm0, %v47_v4, %v78_v11  ;;  %v71_v18 = vld [vmem:[%s70_s15] sm:$0x1]  ;;  %s74_s17 = scalar_lea.vmem [#allocation4], %s507_s2  ;;  %s525_s0 = sld [smem:[#allocation3 + $0xd]] }
  0x2f   :  { %v87_v19 = vrot.slane %v64_v12, 4  ;;  %v101_v20 = vsel %vm100_vm1, %v99_v17, %v81_v14  ;;  %v72_v21 = vadd.f32 %v71_v18, %v63_v2  ;;  %v75_v22 = vld [vmem:[%s74_s17] sm:$0x1]  ;;  %s114_s20 = scalar_lea.vmem [#allocation4], %s509_s8  ;;  %s529_s21 = sld [smem:[#allocation3 + $0xe]] }
  0x30   :  { %v90_v23 = vrot.slane %v68_v15, 3  ;;  %v103_v24 = vsel %vm102_vm2, %v101_v20, %v84_v16  ;;  %v76_v25 = vadd.f32 %v75_v22, %v63_v2  ;;  %v115_v27 = vld [vmem:[%s114_s20] sm:$0x1]  ;;  %s532_s22 = sld [smem:[#allocation3 + $0xf]]  ;;  %s119_s23 = scalar_lea.vmem [#allocation4], %s511_s11 }
  0x31   :  { %v105_v26 = vsel %vm104_vm3, %v103_v24, %v87_v19  ;;  %v93_v29 = vrot.slane %v72_v21, 2  ;;  %v120_v33 = vld [vmem:[%s119_s23] sm:$0x1]  ;;  %s535_s24 = sld [smem:[#allocation3 + $0x10]]  ;;  %v117_v35 = vadd.f32 %v116_v28, %v115_v27  ;;  %s123_s25 = scalar_lea.vmem [#allocation4], %s514_s13 }
  0x32   :  { %v107_v30 = vsel %vm106_vm4, %v105_v26, %v90_v23  ;;  %v96_v32 = vrot.slane %v76_v25, 1  ;;  %v121_v36 = vadd.f32 %v120_v33, %v116_v28  ;;  %v124_v37 = vld [vmem:[%s123_s25] sm:$0x1]  ;;  %s539_s26 = sld [smem:[#allocation3 + $0x11]]  ;;  %s127_s1 = scalar_lea.vmem [#allocation4], %s517_s14 }
  0x33   :  { %v109_v34 = vsel %vm108_vm5, %v107_v30, %v93_v29  ;;  %v125_v39 = vadd.f32 %v124_v37, %v116_v28  ;;  %v128_v40 = vld [vmem:[%s127_s1] sm:$0x1]  ;;  %s543_s27 = sld [smem:[#allocation3 + $0x12]]  ;;  %s131_s28 = scalar_lea.vmem [#allocation4], %s521_s16  ;;  %v196_v4 = vld [vmem:[#allocation7 + $0x5] sm:$0x1] }
  0x34   :  { %v111_v38 = vsel %vm110_vm6, %v109_v34, %v96_v32  ;;  %v129_v41 = vadd.f32 %v128_v40, %v116_v28  ;;  %v132_v42 = vld [vmem:[%s131_s28] sm:$0x1]  ;;  %v148_v43 = vrot.slane %v121_v36, 7  ;;  %s546_s29 = sld [smem:[#allocation3 + $0x13]]  ;;  %s136_s30 = scalar_lea.vmem [#allocation4], %s525_s0 }
  0x35   :  { %112 = vst [vmem:[#allocation9] sm:$0xff] %v111_v38  ;;  %v134_v44 = vadd.f32 %v133_v31, %v132_v42  ;;  %v137_v45 = vld [vmem:[%s136_s30] sm:$0x1]  ;;  %v151_v46 = vrot.slane %v125_v39, 6  ;;  %s549_s4 = sld [smem:[#allocation3 + $0x14]]  ;;  %s140_s5 = scalar_lea.vmem [#allocation4], %s529_s21 }
  0x36   :  { %v138_v48 = vadd.f32 %v137_v45, %v133_v31  ;;  %v141_v49 = vld [vmem:[%s140_s5] sm:$0x1]  ;;  %v154_v50 = vrot.slane %v129_v41, 5  ;;  %v168_v51 = vsel %vm98_vm0, %v117_v35, %v148_v43  ;;  %s553_s6 = sld [smem:[#allocation3 + $0x15]]  ;;  %s144_s2 = scalar_lea.vmem [#allocation4], %s532_s22 }
  0x37   :  { %v142_v52 = vadd.f32 %v141_v49, %v133_v31  ;;  %v145_v53 = vld [vmem:[%s144_s2] sm:$0x1]  ;;  %v157_v54 = vrot.slane %v134_v44, 4  ;;  %v169_v55 = vsel %vm100_vm1, %v168_v51, %v151_v46  ;;  %s557_s7 = sld [smem:[#allocation3 + $0x16]]  ;;  %s177_s8 = scalar_lea.vmem [#allocation4], %s535_s24 }
  0x38   :  { %v146_v56 = vadd.f32 %v145_v53, %v133_v31  ;;  %v160_v57 = vrot.slane %v138_v48, 3  ;;  %v170_v58 = vsel %vm102_vm2, %v169_v55, %v154_v50  ;;  %v178_v59 = vld [vmem:[%s177_s8] sm:$0x1]  ;;  %s561_s9 = sld [smem:[#allocation3 + $0x17]]  ;;  %s182_s10 = scalar_lea.vmem [#allocation4], %s539_s26 }
  0x39   :  { %v163_v60 = vrot.slane %v142_v52, 2  ;;  %v171_v61 = vsel %vm104_vm3, %v170_v58, %v157_v54  ;;  %v183_v62 = vld [vmem:[%s182_s10] sm:$0x1]  ;;  %s565_s11 = sld [smem:[#allocation3 + $0x18]]  ;;  %v180_v1 = vadd.f32 %v179_v47, %v178_v59  ;;  %s186_s12 = scalar_lea.vmem [#allocation4], %s543_s27 }
  0x3a   :  { %v166_v63 = vrot.slane %v146_v56, 1  ;;  %v172_v0 = vsel %vm106_vm4, %v171_v61, %v160_v57  ;;  %v184_v2 = vadd.f32 %v183_v62, %v179_v47  ;;  %v187_v3 = vld [vmem:[%s186_s12] sm:$0x1]  ;;  %s190_s13 = scalar_lea.vmem [#allocation4], %s546_s29  ;;  %s571_s14 = sld [smem:[#allocation3 + $0x19]] }
  0x3b   :  { %v173_v5 = vsel %vm108_vm5, %v172_v0, %v163_v60  ;;  %v188_v6 = vadd.f32 %v187_v3, %v179_v47  ;;  %v191_v7 = vld [vmem:[%s190_s13] sm:$0x1]  ;;  %s194_s15 = scalar_lea.vmem [#allocation4], %s549_s4  ;;  %s575_s16 = sld [smem:[#allocation3 + $0x1a]]  ;;  %v242_v23 = vld [vmem:[#allocation7 + $0x6] sm:$0x1] }
  0x3c   :  { %v174_v8 = vsel %vm110_vm6, %v173_v5, %v166_v63  ;;  %v192_v9 = vadd.f32 %v191_v7, %v179_v47  ;;  %v195_v10 = vld [vmem:[%s194_s15] sm:$0x1]  ;;  %v211_v11 = vrot.slane %v184_v2, 7  ;;  %s199_s17 = scalar_lea.vmem [#allocation4], %s553_s6  ;;  %s578_s0 = sld [smem:[#allocation3 + $0x1b]] }
  0x3d   :  { %175 = vst [vmem:[#allocation9 + $0x8] sm:$0xff] %v174_v8  ;;  %v197_v12 = vadd.f32 %v196_v4, %v195_v10  ;;  %v200_v13 = vld [vmem:[%s199_s17] sm:$0x1]  ;;  %v214_v14 = vrot.slane %v188_v6, 6  ;;  %s203_s20 = scalar_lea.vmem [#allocation4], %s557_s7  ;;  %s582_s21 = sld [smem:[#allocation3 + $0x1c]] }
  0x3e   :  { %v201_v15 = vadd.f32 %v200_v13, %v196_v4  ;;  %v204_v16 = vld [vmem:[%s203_s20] sm:$0x1]  ;;  %v217_v17 = vrot.slane %v192_v9, 5  ;;  %v231_v18 = vsel %vm98_vm0, %v180_v1, %v211_v11  ;;  %s207_s22 = scalar_lea.vmem [#allocation4], %s561_s9  ;;  %s380_s24 = sld [smem:[#allocation3 + $0x1d]] }
  0x3f   :  { %v205_v19 = vadd.f32 %v204_v16, %v196_v4  ;;  %v208_v20 = vld [vmem:[%s207_s22] sm:$0x1]  ;;  %v220_v21 = vrot.slane %v197_v12, 4  ;;  %v232_v22 = vsel %vm100_vm1, %v231_v18, %v214_v14  ;;  %s240_s23 = scalar_lea.vmem [#allocation4], %s565_s11  ;;  %s589_s25 = sld [smem:[#allocation3 + $0x1e]] }
  0x40   :  { %v209_v24 = vadd.f32 %v208_v20, %v196_v4  ;;  %v223_v25 = vrot.slane %v201_v15, 3  ;;  %v233_v26 = vsel %vm102_vm2, %v232_v22, %v217_v17  ;;  %v241_v27 = vld [vmem:[%s240_s23] sm:$0x1]  ;;  %s245_s26 = scalar_lea.vmem [#allocation4], %s571_s14  ;;  %s593_s1 = sld [smem:[#allocation3 + $0x1f]] }
  0x41   :  { %v226_v28 = vrot.slane %v205_v19, 2  ;;  %v234_v29 = vsel %vm104_vm3, %v233_v26, %v220_v21  ;;  %v246_v32 = vld [vmem:[%s245_s26] sm:$0x1]  ;;  %v243_v34 = vadd.f32 %v242_v23, %v241_v27  ;;  %s249_s27 = scalar_lea.vmem [#allocation4], %s575_s16  ;;  %v259_v37 = vld [vmem:[#allocation7 + $0x7] sm:$0x1] }
  0x42   :  { %v229_v30 = vrot.slane %v209_v24, 1  ;;  %v235_v31 = vsel %vm106_vm4, %v234_v29, %v223_v25  ;;  %v247_v35 = vadd.f32 %v246_v32, %v242_v23  ;;  %v250_v36 = vld [vmem:[%s249_s27] sm:$0x1]  ;;  %s253_s28 = scalar_lea.vmem [#allocation4], %s578_s0  ;;  %s470_s6 = smov [#allocation9]  }
  0x43   :  { %v236_v33 = vsel %vm108_vm5, %v235_v31, %v226_v28  ;;  %v251_v39 = vadd.f32 %v250_v36, %v242_v23  ;;  %v254_v40 = vld [vmem:[%s253_s28] sm:$0x1]  ;;  %s257_s29 = scalar_lea.vmem [#allocation4], %s582_s21  ;;  %s307_s2 = sshll.u32 %s470_s6, 4  ;;  %s308_s2 = int_to_ptr.vmem [resolvable:$true] %s307_s2 }
  0x44   :  { %v237_v38 = vsel %vm110_vm6, %v236_v33, %v229_v30  ;;  %v255_v41 = vadd.f32 %v254_v40, %v242_v23  ;;  %v258_v42 = vld [vmem:[%s257_s29] sm:$0x1]  ;;  %v274_v43 = vrot.slane %v247_v35, 7  ;;  %s262_s30 = scalar_lea.vmem [#allocation4], %s380_s24  ;;  %s437_s7 = scalar_lea.vmem %s308_s2, 512 }
  0x45   :  { %238 = vst [vmem:[#allocation9 + $0x10] sm:$0xff] %v237_v38  ;;  %v260_v44 = vadd.f32 %v259_v37, %v258_v42  ;;  %v277_v45 = vrot.slane %v251_v39, 6  ;;  %v263_v46 = vld [vmem:[%s262_s30] sm:$0x1]  ;;  %s266_s4 = scalar_lea.vmem [#allocation4], %s589_s25  ;;  %p438_p10 = scmp.ne.s32.totalorder %s308_s2, %s437_s7 }
  0x46   :  { %v280_v47 = vrot.slane %v255_v41, 5  ;;  %v294_v48 = vsel %vm98_vm0, %v243_v34, %v274_v43  ;;  %v264_v49 = vadd.f32 %v263_v46, %v259_v37  ;;  %v267_v50 = vld [vmem:[%s266_s4] sm:$0x1]  ;;  %s270_s5 = scalar_lea.vmem [#allocation4], %s593_s1  ;;  %p442_p11 = scmp.lt.s32.totalorder %s308_s2, %s308_s2 }
  0x47   :  { %v283_v51 = vrot.slane %v260_v44, 4  ;;  %v295_v52 = vsel %vm100_vm1, %v294_v48, %v277_v45  ;;  %v268_v53 = vadd.f32 %v267_v50, %v259_v37  ;;  %v271_v54 = vld [vmem:[%s270_s5] sm:$0x1]  ;;  %p443_p12 = scmp.lt.s32.totalorder %s437_s7, %s437_s7 }
  0x48   :  { %v296_v55 = vsel %vm102_vm2, %v295_v52, %v280_v47  ;;  %v272_v56 = vadd.f32 %v271_v54, %v259_v37  ;;  %v286_v57 = vrot.slane %v264_v49, 3 }
  0x49   :  { %v297_v58 = vsel %vm104_vm3, %v296_v55, %v283_v51  ;;  %v289_v59 = vrot.slane %v268_v53, 2  ;;  %p444_p13 = por %p443_p12, %p442_p11 }
  0x4a   :  { %v292_v60 = vrot.slane %v272_v56, 1  ;;  %v298_v61 = vsel %vm106_vm4, %v297_v58, %v286_v57 }
  0x4b   :  { %v299_v62 = vsel %vm108_vm5, %v298_v61, %v289_v59  ;;  %p445_p0 = pnand %p444_p13, %p438_p10 }
  0x4c   :  { %v300_v63 = vsel %vm110_vm6, %v299_v62, %v292_v60 }
  0x4d   :  { %301 = vst [vmem:[#allocation9 + $0x18] sm:$0xff] %v300_v63 }
  0x4e   :  { %448 = shalt.err (!%p445_p0)
}
  0x4f   :  { %313 = dma.vmem_to_hbm [thread:$0]  %s308_s2, 512, %s618_s3, [#allocation6], %s467_s18, %s467_s18, %s468_s19  }
  0x50   :  { %463 = dma.done.wait [#allocation6], 512  }
  0x51   :  { %464 = vsyncadd [#allocation6], 4294966784 }
  0x52   :  { %317 = vsyncpa [#allocation5], 1 }
  0x53   :  { %318 = vsyncpa [#allocation8], 1 }
  0x54   :  { %319 = vsyncpa [#allocation6], 1 }

</bundles_post_ra>
